<compile_context>
chip_gen: v7x
topology: tpu7x:2x2x1
jax: 0.10.0
libtpu: 0.0.40
codegen_flags: <defaults>
</compile_context>

<pallas_src>
import functools
import math

import jax
import jax.numpy as jnp
from jax.experimental import pallas as pl
from jax.experimental.pallas import tpu as pltpu


def _round_up(x, m):
    return (x + m - 1) // m * m


def _vmem_budget_bytes():
    """Generation-aware scoped-VMEM budget (v5e/v6e: 128 MiB, v7x: 64 MiB)."""
    cap = 64 * 1024 * 1024
    try:
        info = pltpu.get_tpu_info()
        cap = int(getattr(info, "vmem_capacity_bytes", cap) or cap)
    except Exception:
        pass
    # Leave headroom for compiler scratch; never ask for more than ~100 MiB.
    return int(min(cap * 3 // 4, 100 * 1024 * 1024))


def _choose_row_tile(n_p, vmem_budget):
    """Largest row tile (multiple of 128 dividing n_p) whose double-buffered
    bf16 adj stripe stays well inside the VMEM budget."""
    for tm in (1024, 512, 256, 128):
        if n_p % tm == 0 and 2 * tm * n_p * 2 <= vmem_budget // 4:
            return tm
    return 128


# ---------------------------------------------------------------------------
# Kernels
# ---------------------------------------------------------------------------

def support1_kernel(x_ref, w1t_ref, s1_ref):
    # support1 = x_aug @ W1t_aug  (== x @ W1^T + b1 via ones-col / bias-row)
    s1_ref[...] = jnp.dot(
        x_ref[...], w1t_ref[...],
        preferred_element_type=jnp.float32).astype(s1_ref.dtype)


def pass1_kernel(adj_ref, s1_ref, w2t_ref, s2_ref, *, nhid, use_relu):
    # h_rows = relu(adj_rows @ support1); write a ones column into the hidden
    # padding (col `nhid`) so b2 (stored at row `nhid` of W2t_aug) is folded
    # into the second matmul for free.
    h = jnp.dot(adj_ref[...], s1_ref[...], preferred_element_type=jnp.float32)
    if use_relu:
        h = jnp.maximum(h, 0.0)
    col = jax.lax.broadcasted_iota(jnp.int32, h.shape, dimension=1)
    h = jnp.where(col == nhid, 1.0, h)
    s2_ref[...] = jnp.dot(
        h.astype(jnp.bfloat16), w2t_ref[...],
        preferred_element_type=jnp.float32).astype(s2_ref.dtype)


def pass2_kernel(adj_ref, s2_ref, out_ref):
    out_ref[...] = jnp.dot(
        adj_ref[...], s2_ref[...],
        preferred_element_type=jnp.float32).astype(out_ref.dtype)


# ---------------------------------------------------------------------------
# Wrapper
# ---------------------------------------------------------------------------

@functools.partial(jax.jit, static_argnames=("use_relu",))
def gcn_classifier_forward(x, adj, params, use_relu=True):
    """Two-layer GCN forward (inference semantics)."""
    # TODO(synk): F.dropout is identity at inference (training=False); the
    # stochastic training-mode mask is not implemented here.
    w1, b1, w2, b2 = params            # torch layout: W [out, in], b [out]
    n, nfeat = x.shape
    nhid = w1.shape[0]
    nclass = w2.shape[0]

    bf16 = jnp.bfloat16
    # Lane-dense padding; "+1" reserves a padded column/row for bias folding.
    n_p = _round_up(n, 128)
    nfeat_p = _round_up(nfeat + 1, 128)
    nhid_p = _round_up(nhid + 1, 128)
    nclass_p = _round_up(nclass, 128)

    # Augmented, zero-padded bf16 operands (zero padding is exact here).
    x_aug = (jnp.zeros((n_p, nfeat_p), bf16)
             .at[:n, :nfeat].set(x.astype(bf16))
             .at[:n, nfeat].set(1.0))                       # ones column
    adj_p = jnp.zeros((n_p, n_p), bf16).at[:n, :n].set(adj.astype(bf16))
    w1t_aug = (jnp.zeros((nfeat_p, nhid_p), bf16)
               .at[:nfeat, :nhid].set(w1.T.astype(bf16))
               .at[nfeat, :nhid].set(b1.astype(bf16)))      # b1 row
    w2t_aug = (jnp.zeros((nhid_p, nclass_p), bf16)
               .at[:nhid, :nclass].set(w2.T.astype(bf16))
               .at[nhid, :nclass].set(b2.astype(bf16)))     # b2 row

    vmem_limit = _vmem_budget_bytes()
    tm = _choose_row_tile(n_p, vmem_limit)
    grid = (n_p // tm,)
    cparams = pltpu.CompilerParams(
        dimension_semantics=("parallel",), vmem_limit_bytes=vmem_limit)

    # --- pre-pass: support1 = x @ W1^T + b1 ------------------------------
    s1 = pl.pallas_call(
        support1_kernel,
        out_shape=jax.ShapeDtypeStruct((n_p, nhid_p), bf16),
        grid=grid,
        in_specs=[pl.BlockSpec((tm, nfeat_p), lambda i: (i, 0)),
                  pl.BlockSpec((nfeat_p, nhid_p), lambda i: (0, 0))],
        out_specs=pl.BlockSpec((tm, nhid_p), lambda i: (i, 0)),
        cost_estimate=pl.CostEstimate(
            flops=2 * n_p * nfeat_p * nhid_p, transcendentals=0,
            bytes_accessed=(n_p * nfeat_p + nfeat_p * nhid_p
                            + n_p * nhid_p) * 2),
        compiler_params=cparams,
    )(x_aug, w1t_aug)

    # --- pass 1: support2 = relu(adj @ support1) @ W2^T + b2 -------------
    s2 = pl.pallas_call(
        functools.partial(pass1_kernel, nhid=nhid, use_relu=use_relu),
        out_shape=jax.ShapeDtypeStruct((n_p, nclass_p), bf16),
        grid=grid,
        in_specs=[pl.BlockSpec((tm, n_p), lambda i: (i, 0)),       # adj stripe
                  pl.BlockSpec((n_p, nhid_p), lambda i: (0, 0)),   # resident
                  pl.BlockSpec((nhid_p, nclass_p), lambda i: (0, 0))],
        out_specs=pl.BlockSpec((tm, nclass_p), lambda i: (i, 0)),
        cost_estimate=pl.CostEstimate(
            flops=2 * n_p * n_p * nhid_p + 2 * n_p * nhid_p * nclass_p,
            transcendentals=0,
            bytes_accessed=(n_p * n_p + n_p * nhid_p + nhid_p * nclass_p
                            + n_p * nclass_p) * 2),
        compiler_params=cparams,
    )(adj_p, s1, w2t_aug)

    # --- pass 2: out = adj @ support2 -------------------------------------
    out_p = pl.pallas_call(
        pass2_kernel,
        out_shape=jax.ShapeDtypeStruct((n_p, nclass_p), jnp.float32),
        grid=grid,
        in_specs=[pl.BlockSpec((tm, n_p), lambda i: (i, 0)),
                  pl.BlockSpec((n_p, nclass_p), lambda i: (0, 0))],
        out_specs=pl.BlockSpec((tm, nclass_p), lambda i: (i, 0)),
        cost_estimate=pl.CostEstimate(
            flops=2 * n_p * n_p * nclass_p, transcendentals=0,
            bytes_accessed=(n_p * n_p + n_p * nclass_p) * 2
                           + n_p * nclass_p * 4),
        compiler_params=cparams,
    )(adj_p, s2)

    return out_p[:n, :nclass]


# ---------------------------------------------------------------------------
# Init + references + demo
# ---------------------------------------------------------------------------

def init_gcn_params(key, nfeat, nhid, nclass):
    """Deterministic init mirroring GraphConvolution.__init__/init()."""
    k1, k2, k3, k4 = jax.random.split(key, 4)
    s1 = 1.0 / math.sqrt(nfeat)
    w1 = jax.random.uniform(k1, (nhid, nfeat), jnp.float32, -s1, s1)
    b1 = jax.random.uniform(k2, (nhid,), jnp.float32, -s1, s1)
    s2 = 1.0 / math.sqrt(nhid)
    w2 = jax.random.uniform(k3, (nclass, nhid), jnp.float32, -s2, s2)
    b2 = jax.random.uniform(k4, (nclass,), jnp.float32, -s2, s2)
    return w1, b1, w2, b2


def _mirrored_reference(x, adj, params, use_relu=True):
    """Plain-JAX reference replaying the kernel's exact casts / ordering."""
    w1, b1, w2, b2 = params
    f32, bf16 = jnp.float32, jnp.bfloat16
    adj_b = adj.astype(bf16)
    s1 = (jnp.dot(x.astype(bf16), w1.T.astype(bf16), preferred_element_type=f32)
          + b1.astype(bf16).astype(f32))
    h = jnp.dot(adj_b, s1.astype(bf16), preferred_element_type=f32)
    if use_relu:
        h = jnp.maximum(h, 0.0)
    s2 = (jnp.dot(h.astype(bf16), w2.T.astype(bf16), preferred_element_type=f32)
          + b2.astype(bf16).astype(f32))
    return jnp.dot(adj_b, s2.astype(bf16), preferred_element_type=f32)


def _f32_reference(x, adj, params, use_relu=True):
    """Full-precision semantic reference of the PyTorch module."""
    w1, b1, w2, b2 = params
    hp = jax.lax.Precision.HIGHEST
    h = adj @ (jnp.dot(x, w1.T, precision=hp) + b1)
    if use_relu:
        h = jnp.maximum(h, 0.0)
    return adj @ (jnp.dot(h, w2.T, precision=hp) + b2)


if __name__ == "__main__":
    # Small shapes consistent with the module: N nodes, nfeat -> nhid -> nclass.
    N, NFEAT, NHID, NCLASS = 128, 32, 64, 8

    key = jax.random.PRNGKey(0)
    k_x, k_adj, k_params = jax.random.split(key, 3)

    x = jax.random.normal(k_x, (N, NFEAT), jnp.float32)

    # Deterministic dense "sparse" adjacency: non-negative, row-normalized.
    a = jax.random.uniform(k_adj, (N, N), jnp.float32)
    a = jnp.where(a > 0.8, a, 0.0) + jnp.eye(N, dtype=jnp.float32)
    adj = a / jnp.sum(a, axis=1, keepdims=True)

    params = init_gcn_params(k_params, NFEAT, NHID, NCLASS)

    out = gcn_classifier_forward(x, adj, params, use_relu=True)
    jax.block_until_ready(out)
    assert out.shape == (N, NCLASS)

    # Tight check against a reference mirroring the kernel's bf16 casts.
    ref_bf16 = _mirrored_reference(x, adj, params, use_relu=True)
    assert jnp.allclose(out, ref_bf16, atol=2e-3, rtol=2e-2), (
        float(jnp.max(jnp.abs(out - ref_bf16))))

    # Loose semantic check against the full-precision PyTorch-equivalent math.
    ref_f32 = _f32_reference(x, adj, params, use_relu=True)
    assert jnp.allclose(out, ref_f32, atol=5e-2, rtol=5e-2), (
        float(jnp.max(jnp.abs(out - ref_f32))))

    print("KERNEL_OK")
</pallas_src>

<mosaic_0001>
module attributes {stable_mosaic.version = 11 : i64} {
  func.func @support1_kernel(%arg0: i32, %arg1: memref<128x128xbf16, #tpu.memory_space<vmem>>, %arg2: memref<128x128xbf16, #tpu.memory_space<vmem>>, %arg3: memref<128x128xbf16, #tpu.memory_space<vmem>>) attributes {dimension_semantics = [#tpu.dimension_semantics<parallel>], iteration_bounds = array<i64: 1>, scalar_prefetch = 0 : i64, scratch_operands = 0 : i64, tpu.core_type = #tpu.core_type<tc>, window_params = [{transform_indices = @transform_0, window_bounds = array<i64: 128, 128>}, {pipeline_mode = #tpu.pipeline_mode<synchronous>, transform_indices = @transform_1, window_bounds = array<i64: 128, 128>}, {transform_indices = @transform_2, window_bounds = array<i64: 128, 128>}]} {
    %c0 = arith.constant 0 : index
    %c0_0 = arith.constant 0 : index
    %0 = vector.load %arg1[%c0, %c0_0] : memref<128x128xbf16, #tpu.memory_space<vmem>>, vector<128x128xbf16>
    %c0_1 = arith.constant 0 : index
    %c0_2 = arith.constant 0 : index
    %1 = vector.load %arg2[%c0_1, %c0_2] : memref<128x128xbf16, #tpu.memory_space<vmem>>, vector<128x128xbf16>
    %cst = arith.constant dense<0.000000e+00> : vector<128x128xf32>
    %2 = tpu.matmul %0, %1, %cst {dimension_numbers = #tpu.dot_dimension_numbers<[1], [0], [0], [1], [0, 0, 1, 1], [], []>} : vector<128x128xbf16>, vector<128x128xbf16>, vector<128x128xf32> -> vector<128x128xf32>
    %3 = arith.truncf %2 : vector<128x128xf32> to vector<128x128xbf16>
    %c0_3 = arith.constant 0 : index
    %c0_4 = arith.constant 0 : index
    %4 = vector.load %arg3[%c0_3, %c0_4] : memref<128x128xbf16, #tpu.memory_space<vmem>>, vector<128x128xbf16>
    tpu.vector_store %arg3[%c0_3, %c0_4], %3 {strides = array<i32>} : memref<128x128xbf16, #tpu.memory_space<vmem>>, vector<128x128xbf16>,
    return
  }
  func.func @transform_0(%arg0: i32) -> (i32, i32) {
    %c0_i32 = arith.constant 0 : i32
    %c0_i32_0 = arith.constant 0 : i32
    return %arg0, %c0_i32 : i32, i32
  }
  func.func @transform_1(%arg0: i32) -> (i32, i32) {
    %c0_i32 = arith.constant 0 : i32
    %c0_i32_0 = arith.constant 0 : i32
    %c0_i32_1 = arith.constant 0 : i32
    return %c0_i32, %c0_i32_0 : i32, i32
  }
  func.func @transform_2(%arg0: i32) -> (i32, i32) {
    %c0_i32 = arith.constant 0 : i32
    %c0_i32_0 = arith.constant 0 : i32
    return %arg0, %c0_i32 : i32, i32
  }
}

module attributes {stable_mosaic.version = 11 : i64} {
  func.func @pass1_kernel(%arg0: i32, %arg1: memref<128x128xbf16, #tpu.memory_space<vmem>>, %arg2: memref<128x128xbf16, #tpu.memory_space<vmem>>, %arg3: memref<128x128xbf16, #tpu.memory_space<vmem>>, %arg4: memref<128x128xbf16, #tpu.memory_space<vmem>>) attributes {dimension_semantics = [#tpu.dimension_semantics<parallel>], iteration_bounds = array<i64: 1>, scalar_prefetch = 0 : i64, scratch_operands = 0 : i64, tpu.core_type = #tpu.core_type<tc>, window_params = [{transform_indices = @transform_0, window_bounds = array<i64: 128, 128>}, {pipeline_mode = #tpu.pipeline_mode<synchronous>, transform_indices = @transform_1, window_bounds = array<i64: 128, 128>}, {pipeline_mode = #tpu.pipeline_mode<synchronous>, transform_indices = @transform_2, window_bounds = array<i64: 128, 128>}, {transform_indices = @transform_3, window_bounds = array<i64: 128, 128>}]} {
    %c0 = arith.constant 0 : index
    %c0_0 = arith.constant 0 : index
    %0 = vector.load %arg1[%c0, %c0_0] : memref<128x128xbf16, #tpu.memory_space<vmem>>, vector<128x128xbf16>
    %c0_1 = arith.constant 0 : index
    %c0_2 = arith.constant 0 : index
    %1 = vector.load %arg2[%c0_1, %c0_2] : memref<128x128xbf16, #tpu.memory_space<vmem>>, vector<128x128xbf16>
    %cst = arith.constant dense<0.000000e+00> : vector<128x128xf32>
    %2 = tpu.matmul %0, %1, %cst {dimension_numbers = #tpu.dot_dimension_numbers<[1], [0], [0], [1], [0, 0, 1, 1], [], []>} : vector<128x128xbf16>, vector<128x128xbf16>, vector<128x128xf32> -> vector<128x128xf32>
    %cst_3 = arith.constant 0.000000e+00 : f32
    %3 = vector.broadcast %cst_3 : f32 to vector<128x128xf32>
    %4 = arith.maximumf %2, %3 : vector<128x128xf32>
    %5 = tpu.iota {dimensions = array<i32: 1>} : vector<128x128xi32>
    %c64_i32 = arith.constant 64 : i32
    %6 = vector.broadcast %c64_i32 : i32 to vector<128x128xi32>
    %7 = arith.cmpi eq, %5, %6 : vector<128x128xi32>
    %cst_4 = arith.constant 1.000000e+00 : f32
    %8 = vector.broadcast %cst_4 : f32 to vector<128x128xf32>
    %9 = arith.select %7, %8, %4 : vector<128x128xi1>, vector<128x128xf32>
    %10 = arith.truncf %9 : vector<128x128xf32> to vector<128x128xbf16>
    %c0_5 = arith.constant 0 : index
    %c0_6 = arith.constant 0 : index
    %11 = vector.load %arg3[%c0_5, %c0_6] : memref<128x128xbf16, #tpu.memory_space<vmem>>, vector<128x128xbf16>
    %cst_7 = arith.constant dense<0.000000e+00> : vector<128x128xf32>
    %12 = tpu.matmul %10, %11, %cst_7 {dimension_numbers = #tpu.dot_dimension_numbers<[1], [0], [0], [1], [0, 0, 1, 1], [], []>} : vector<128x128xbf16>, vector<128x128xbf16>, vector<128x128xf32> -> vector<128x128xf32>
    %13 = arith.truncf %12 : vector<128x128xf32> to vector<128x128xbf16>
    %c0_8 = arith.constant 0 : index
    %c0_9 = arith.constant 0 : index
    %14 = vector.load %arg4[%c0_8, %c0_9] : memref<128x128xbf16, #tpu.memory_space<vmem>>, vector<128x128xbf16>
    tpu.vector_store %arg4[%c0_8, %c0_9], %13 {strides = array<i32>} : memref<128x128xbf16, #tpu.memory_space<vmem>>, vector<128x128xbf16>,
    return
  }
  func.func @transform_0(%arg0: i32) -> (i32, i32) {
    %c0_i32 = arith.constant 0 : i32
    %c0_i32_0 = arith.constant 0 : i32
    return %arg0, %c0_i32 : i32, i32
  }
  func.func @transform_1(%arg0: i32) -> (i32, i32) {
    %c0_i32 = arith.constant 0 : i32
    %c0_i32_0 = arith.constant 0 : i32
    %c0_i32_1 = arith.constant 0 : i32
    return %c0_i32, %c0_i32_0 : i32, i32
  }
  func.func @transform_2(%arg0: i32) -> (i32, i32) {
    %c0_i32 = arith.constant 0 : i32
    %c0_i32_0 = arith.constant 0 : i32
    %c0_i32_1 = arith.constant 0 : i32
    return %c0_i32, %c0_i32_0 : i32, i32
  }
  func.func @transform_3(%arg0: i32) -> (i32, i32) {
    %c0_i32 = arith.constant 0 : i32
    %c0_i32_0 = arith.constant 0 : i32
    return %arg0, %c0_i32 : i32, i32
  }
}

module attributes {stable_mosaic.version = 11 : i64} {
  func.func @pass2_kernel(%arg0: i32, %arg1: memref<128x128xbf16, #tpu.memory_space<vmem>>, %arg2: memref<128x128xbf16, #tpu.memory_space<vmem>>, %arg3: memref<128x128xf32, #tpu.memory_space<vmem>>) attributes {dimension_semantics = [#tpu.dimension_semantics<parallel>], iteration_bounds = array<i64: 1>, scalar_prefetch = 0 : i64, scratch_operands = 0 : i64, tpu.core_type = #tpu.core_type<tc>, window_params = [{transform_indices = @transform_0, window_bounds = array<i64: 128, 128>}, {pipeline_mode = #tpu.pipeline_mode<synchronous>, transform_indices = @transform_1, window_bounds = array<i64: 128, 128>}, {transform_indices = @transform_2, window_bounds = array<i64: 128, 128>}]} {
    %c0 = arith.constant 0 : index
    %c0_0 = arith.constant 0 : index
    %0 = vector.load %arg1[%c0, %c0_0] : memref<128x128xbf16, #tpu.memory_space<vmem>>, vector<128x128xbf16>
    %c0_1 = arith.constant 0 : index
    %c0_2 = arith.constant 0 : index
    %1 = vector.load %arg2[%c0_1, %c0_2] : memref<128x128xbf16, #tpu.memory_space<vmem>>, vector<128x128xbf16>
    %cst = arith.constant dense<0.000000e+00> : vector<128x128xf32>
    %2 = tpu.matmul %0, %1, %cst {dimension_numbers = #tpu.dot_dimension_numbers<[1], [0], [0], [1], [0, 0, 1, 1], [], []>} : vector<128x128xbf16>, vector<128x128xbf16>, vector<128x128xf32> -> vector<128x128xf32>
    %c0_3 = arith.constant 0 : index
    %c0_4 = arith.constant 0 : index
    %3 = vector.load %arg3[%c0_3, %c0_4] : memref<128x128xf32, #tpu.memory_space<vmem>>, vector<128x128xf32>
    tpu.vector_store %arg3[%c0_3, %c0_4], %2 {strides = array<i32>} : memref<128x128xf32, #tpu.memory_space<vmem>>, vector<128x128xf32>,
    return
  }
  func.func @transform_0(%arg0: i32) -> (i32, i32) {
    %c0_i32 = arith.constant 0 : i32
    %c0_i32_0 = arith.constant 0 : i32
    return %arg0, %c0_i32 : i32, i32
  }
  func.func @transform_1(%arg0: i32) -> (i32, i32) {
    %c0_i32 = arith.constant 0 : i32
    %c0_i32_0 = arith.constant 0 : i32
    %c0_i32_1 = arith.constant 0 : i32
    return %c0_i32, %c0_i32_0 : i32, i32
  }
  func.func @transform_2(%arg0: i32) -> (i32, i32) {
    %c0_i32 = arith.constant 0 : i32
    %c0_i32_0 = arith.constant 0 : i32
    return %arg0, %c0_i32 : i32, i32
  }
}

</mosaic_0001>

<bundles_post_ra>
// kernel: gcn_classifier_forward.3
= control target key start
LH: loop header
LB: loop body
LE: loop exit
PB: predicated region body
PF: predicated region fallthrough
CT: control target
= control target key end

     0   :  { %s583_s1 = inlined_call_operand.vmem [shape: bf16[128,128], index: 1, kind: input, shape index: {}]   ;;  %s584_s0 = inlined_call_operand.vmem [shape: bf16[128,128], index: 0, kind: input, shape index: {}]   ;;  %s585_s2 = inlined_call_operand.vmem [shape: bf16[128,128], index: 2, kind: output, shape index: {}]  }
   0x1   :  { %v480_v0 = vld [vmem:[%s583_s1] sm:$0xff]   ;;  %v481_v1 = vld [vmem:[%s583_s1 + $0x8] sm:$0xff]   ;;  %v482_v2 = vld [vmem:[%s583_s1 + $0x10] sm:$0xff]  }
   0x2   :  { %432 = vmatprep.subr.bf16.mxu0 %v480_v0  ;;  %464 = vmatprep.subr.bf16.mxu1 %v480_v0  ;;  %v483_v3 = vld [vmem:[%s583_s1 + $0x18] sm:$0xff]   ;;  %v488_v4 = vld [vmem:[%s584_s0] sm:$0xff]   ;;  %v485_v7 = vld [vmem:[%s583_s1 + $0x28] sm:$0xff]  }
   0x3   :  { %433 = vmatpush3.bf16.msra.mxu0 %v480_v0  ;;  %472 = vmatpush3.bf16.msra.mxu1 %v480_v0  ;;  %v489_v5 = vld [vmem:[%s584_s0 + $0x20] sm:$0xff]   ;;  %v486_v8 = vld [vmem:[%s583_s1 + $0x30] sm:$0xff]   ;;  %v487_v9 = vld [vmem:[%s583_s1 + $0x38] sm:$0xff]  }
   0x4   :  { %434 = vmatprep.subr.bf16.mxu0 %v481_v1  ;;  %465 = vmatprep.subr.bf16.mxu1 %v481_v1  ;;  %v484_v6 = vld [vmem:[%s583_s1 + $0x20] sm:$0xff]   ;;  %v490_v10 = vld [vmem:[%s584_s0 + $0x8] sm:$0xff]   ;;  %v492_v12 = vld [vmem:[%s584_s0 + $0x10] sm:$0xff]  }
   0x5   :  { %448 = vmatprep.mubr.bf16.mxu0 %v488_v4  ;;  %456 = vmatprep.mubr.bf16.mxu1 %v489_v5  ;;  %v491_v11 = vld [vmem:[%s584_s0 + $0x28] sm:$0xff]   ;;  %v493_v13 = vld [vmem:[%s584_s0 + $0x30] sm:$0xff]   ;;  %v494_v14 = vld [vmem:[%s584_s0 + $0x18] sm:$0xff]  }
   0x6   :  { %v495_v15 = vld [vmem:[%s584_s0 + $0x38] sm:$0xff]  }
   0x7   :  { %435 = vmatpush3.bf16.msra.mxu0 %v481_v1  ;;  %473 = vmatpush3.bf16.msra.mxu1 %v481_v1 }
   0x8   :  { %436 = vmatprep.subr.bf16.mxu0 %v482_v2  ;;  %466 = vmatprep.subr.bf16.mxu1 %v482_v2 }
   0xb   :  { %437 = vmatpush3.bf16.msra.mxu0 %v482_v2  ;;  %474 = vmatpush3.bf16.msra.mxu1 %v482_v2 }
   0xc   :  { %438 = vmatprep.subr.bf16.mxu0 %v483_v3  ;;  %467 = vmatprep.subr.bf16.mxu1 %v483_v3 }
   0xf   :  { %439 = vmatpush3.bf16.msra.mxu0 %v483_v3  ;;  %475 = vmatpush3.bf16.msra.mxu1 %v483_v3 }
  0x10   :  { %440 = vmatprep.subr.bf16.mxu0 %v484_v6  ;;  %468 = vmatprep.subr.bf16.mxu1 %v484_v6 }
  0x13   :  { %441 = vmatpush3.bf16.msra.mxu0 %v484_v6  ;;  %476 = vmatpush3.bf16.msra.mxu1 %v484_v6 }
  0x14   :  { %442 = vmatprep.subr.bf16.mxu0 %v485_v7  ;;  %469 = vmatprep.subr.bf16.mxu1 %v485_v7 }
  0x17   :  { %443 = vmatpush3.bf16.msra.mxu0 %v485_v7  ;;  %477 = vmatpush3.bf16.msra.mxu1 %v485_v7 }
  0x18   :  { %444 = vmatprep.subr.bf16.mxu0 %v486_v8  ;;  %470 = vmatprep.subr.bf16.mxu1 %v486_v8 }
  0x1b   :  { %445 = vmatpush3.bf16.msra.mxu0 %v486_v8  ;;  %478 = vmatpush3.bf16.msra.mxu1 %v486_v8 }
  0x1c   :  { %446 = vmatprep.subr.bf16.mxu0 %v487_v9  ;;  %471 = vmatprep.subr.bf16.mxu1 %v487_v9 }
  0x1f   :  { %447 = vmatpush3.bf16.msra.mxu0 %v487_v9  ;;  %479 = vmatpush3.bf16.msra.mxu1 %v487_v9 }
  0x22   :  { %449 = vmatmul.mubr.bf16.vlgmr.msra.gmra.mrb[0].mxu0 %v490_v10  ;;  %457 = vmatmul.mubr.bf16.vlgmr.msra.gmra.mrb[0].mxu1 %v491_v11 }
  0x23   :  { %452 = vmatprep.mubr.bf16.mxu0 %v492_v12  ;;  %460 = vmatprep.mubr.bf16.mxu1 %v493_v13 }
  0x2a   :  { %453 = vmatmul.mubr.bf16.gmra.mrb[4].mxu0 %v494_v14  ;;  %461 = vmatmul.mubr.bf16.gmra.mrb[4].mxu1 %v495_v15 }
  0xf5   :  { %v450_v16 = vpop.f32.mrb[0].mxu0  ;;  %v458_v17 = vpop.f32.mrb[0].mxu1 }
  0xf6   :  { %v174_v18 = vpop.f32.mrb[1].mxu0  ;;  %v206_v19 = vpop.f32.mrb[1].mxu1 }
  0xf7   :  { %v451_v20 = vpop.f32.mrb[2].mxu0  ;;  %v459_v21 = vpop.f32.mrb[2].mxu1 }
  0xf8   :  { %v377_v22 = vpack.c.bf16 %v451_v20, %v450_v16  ;;  %v397_v23 = vpack.c.bf16 %v459_v21, %v458_v17  ;;  %v177_v24 = vpop.f32.mrb[3].mxu0  ;;  %v209_v25 = vpop.f32.mrb[3].mxu1 }
  0xf9   :  { %v372_v26 = vpack.c.bf16 %v177_v24, %v174_v18  ;;  %v392_v27 = vpack.c.bf16 %v209_v25, %v206_v19 }
  0xfa   :  { %409 = vst [vmem:[%s585_s2 + $0x8] sm:$0xff] %v377_v22   ;;  %413 = vst [vmem:[%s585_s2 + $0x28] sm:$0xff] %v397_v23  }
  0xfb   :  { %373 = vst [vmem:[%s585_s2] sm:$0xff] %v372_v26   ;;  %412 = vst [vmem:[%s585_s2 + $0x20] sm:$0xff] %v392_v27  }
  0xfd   :  { %v454_v28 = vpop.f32.mrb[4].mxu0  ;;  %v462_v29 = vpop.f32.mrb[4].mxu1 }
  0xfe   :  { %v190_v30 = vpop.f32.mrb[5].mxu0  ;;  %v222_v31 = vpop.f32.mrb[5].mxu1 }
  0xff   :  { %v455_v32 = vpop.f32.mrb[6].mxu0  ;;  %v463_v33 = vpop.f32.mrb[6].mxu1 }
 0x100   :  { %v387_v34 = vpack.c.bf16 %v455_v32, %v454_v28  ;;  %v407_v35 = vpack.c.bf16 %v463_v33, %v462_v29  ;;  %v193_v36 = vpop.f32.mrb[7].mxu0  ;;  %v225_v37 = vpop.f32.mrb[7].mxu1 }
 0x101   :  { %v382_v38 = vpack.c.bf16 %v193_v36, %v190_v30  ;;  %v402_v39 = vpack.c.bf16 %v225_v37, %v222_v31 }
 0x102   :  { %411 = vst [vmem:[%s585_s2 + $0x18] sm:$0xff] %v387_v34   ;;  %415 = vst [vmem:[%s585_s2 + $0x38] sm:$0xff] %v407_v35  }
 0x103   :  { %410 = vst [vmem:[%s585_s2 + $0x10] sm:$0xff] %v382_v38   ;;  %414 = vst [vmem:[%s585_s2 + $0x30] sm:$0xff] %v402_v39  }

// kernel: gcn_classifier_forward.5
= control target key start
LH: loop header
LB: loop body
LE: loop exit
PB: predicated region body
PF: predicated region fallthrough
CT: control target
= control target key end

     0   :  { %s464_s1 = inlined_call_operand.vmem [shape: bf16[128,128], index: 1, kind: input, shape index: {}]   ;;  %s465_s0 = inlined_call_operand.vmem [shape: bf16[128,128], index: 0, kind: input, shape index: {}]   ;;  %s466_s2 = inlined_call_operand.vmem [shape: f32[128,128], index: 2, kind: output, shape index: {}]  }
   0x1   :  { %v337_v0 = vld [vmem:[%s464_s1] sm:$0xff]   ;;  %v338_v1 = vld [vmem:[%s464_s1 + $0x8] sm:$0xff]   ;;  %v339_v2 = vld [vmem:[%s464_s1 + $0x10] sm:$0xff]  }
   0x2   :  { %289 = vmatprep.subr.bf16.mxu0 %v337_v0  ;;  %321 = vmatprep.subr.bf16.mxu1 %v337_v0  ;;  %v340_v3 = vld [vmem:[%s464_s1 + $0x18] sm:$0xff]   ;;  %v345_v4 = vld [vmem:[%s465_s0] sm:$0xff]   ;;  %v342_v7 = vld [vmem:[%s464_s1 + $0x28] sm:$0xff]  }
   0x3   :  { %290 = vmatpush3.bf16.msra.mxu0 %v337_v0  ;;  %329 = vmatpush3.bf16.msra.mxu1 %v337_v0  ;;  %v346_v5 = vld [vmem:[%s465_s0 + $0x20] sm:$0xff]   ;;  %v343_v8 = vld [vmem:[%s464_s1 + $0x30] sm:$0xff]   ;;  %v344_v9 = vld [vmem:[%s464_s1 + $0x38] sm:$0xff]  }
   0x4   :  { %291 = vmatprep.subr.bf16.mxu0 %v338_v1  ;;  %322 = vmatprep.subr.bf16.mxu1 %v338_v1  ;;  %v341_v6 = vld [vmem:[%s464_s1 + $0x20] sm:$0xff]   ;;  %v347_v10 = vld [vmem:[%s465_s0 + $0x8] sm:$0xff]   ;;  %v349_v12 = vld [vmem:[%s465_s0 + $0x10] sm:$0xff]  }
   0x5   :  { %305 = vmatprep.mubr.bf16.mxu0 %v345_v4  ;;  %313 = vmatprep.mubr.bf16.mxu1 %v346_v5  ;;  %v348_v11 = vld [vmem:[%s465_s0 + $0x28] sm:$0xff]   ;;  %v350_v13 = vld [vmem:[%s465_s0 + $0x30] sm:$0xff]   ;;  %v351_v14 = vld [vmem:[%s465_s0 + $0x18] sm:$0xff]  }
   0x6   :  { %v352_v15 = vld [vmem:[%s465_s0 + $0x38] sm:$0xff]  }
   0x7   :  { %292 = vmatpush3.bf16.msra.mxu0 %v338_v1  ;;  %330 = vmatpush3.bf16.msra.mxu1 %v338_v1 }
   0x8   :  { %293 = vmatprep.subr.bf16.mxu0 %v339_v2  ;;  %323 = vmatprep.subr.bf16.mxu1 %v339_v2 }
   0xb   :  { %294 = vmatpush3.bf16.msra.mxu0 %v339_v2  ;;  %331 = vmatpush3.bf16.msra.mxu1 %v339_v2 }
   0xc   :  { %295 = vmatprep.subr.bf16.mxu0 %v340_v3  ;;  %324 = vmatprep.subr.bf16.mxu1 %v340_v3 }
   0xf   :  { %296 = vmatpush3.bf16.msra.mxu0 %v340_v3  ;;  %332 = vmatpush3.bf16.msra.mxu1 %v340_v3 }
  0x10   :  { %297 = vmatprep.subr.bf16.mxu0 %v341_v6  ;;  %325 = vmatprep.subr.bf16.mxu1 %v341_v6 }
  0x13   :  { %298 = vmatpush3.bf16.msra.mxu0 %v341_v6  ;;  %333 = vmatpush3.bf16.msra.mxu1 %v341_v6 }
  0x14   :  { %299 = vmatprep.subr.bf16.mxu0 %v342_v7  ;;  %326 = vmatprep.subr.bf16.mxu1 %v342_v7 }
  0x17   :  { %300 = vmatpush3.bf16.msra.mxu0 %v342_v7  ;;  %334 = vmatpush3.bf16.msra.mxu1 %v342_v7 }
  0x18   :  { %301 = vmatprep.subr.bf16.mxu0 %v343_v8  ;;  %327 = vmatprep.subr.bf16.mxu1 %v343_v8 }
  0x1b   :  { %302 = vmatpush3.bf16.msra.mxu0 %v343_v8  ;;  %335 = vmatpush3.bf16.msra.mxu1 %v343_v8 }
  0x1c   :  { %303 = vmatprep.subr.bf16.mxu0 %v344_v9  ;;  %328 = vmatprep.subr.bf16.mxu1 %v344_v9 }
  0x1f   :  { %304 = vmatpush3.bf16.msra.mxu0 %v344_v9  ;;  %336 = vmatpush3.bf16.msra.mxu1 %v344_v9 }
  0x22   :  { %306 = vmatmul.mubr.bf16.vlgmr.msra.gmra.mrb[0].mxu0 %v347_v10  ;;  %314 = vmatmul.mubr.bf16.vlgmr.msra.gmra.mrb[0].mxu1 %v348_v11 }
  0x23   :  { %309 = vmatprep.mubr.bf16.mxu0 %v349_v12  ;;  %317 = vmatprep.mubr.bf16.mxu1 %v350_v13 }
  0x2a   :  { %310 = vmatmul.mubr.bf16.gmra.mrb[4].mxu0 %v351_v14  ;;  %318 = vmatmul.mubr.bf16.gmra.mrb[4].mxu1 %v352_v15 }
  0xf5   :  { %v307_v16 = vpop.f32.mrb[0].mxu0  ;;  %v315_v17 = vpop.f32.mrb[0].mxu1 }
  0xf6   :  { %239 = vst [vmem:[%s466_s2 + $0x10] sm:$0xff] %v307_v16  ;;  %247 = vst [vmem:[%s466_s2 + $0x50] sm:$0xff] %v315_v17  ;;  %v174_v18 = vpop.f32.mrb[1].mxu0  ;;  %v206_v19 = vpop.f32.mrb[1].mxu1 }
  0xf7   :  { %237 = vst [vmem:[%s466_s2] sm:$0xff] %v174_v18  ;;  %245 = vst [vmem:[%s466_s2 + $0x40] sm:$0xff] %v206_v19  ;;  %v308_v20 = vpop.f32.mrb[2].mxu0  ;;  %v316_v21 = vpop.f32.mrb[2].mxu1 }
  0xf8   :  { %240 = vst [vmem:[%s466_s2 + $0x18] sm:$0xff] %v308_v20  ;;  %248 = vst [vmem:[%s466_s2 + $0x58] sm:$0xff] %v316_v21  ;;  %v177_v22 = vpop.f32.mrb[3].mxu0  ;;  %v209_v23 = vpop.f32.mrb[3].mxu1 }
  0xf9   :  { %238 = vst [vmem:[%s466_s2 + $0x8] sm:$0xff] %v177_v22  ;;  %246 = vst [vmem:[%s466_s2 + $0x48] sm:$0xff] %v209_v23 }
  0xfd   :  { %v311_v24 = vpop.f32.mrb[4].mxu0  ;;  %v319_v25 = vpop.f32.mrb[4].mxu1 }
  0xfe   :  { %243 = vst [vmem:[%s466_s2 + $0x30] sm:$0xff] %v311_v24  ;;  %251 = vst [vmem:[%s466_s2 + $0x70] sm:$0xff] %v319_v25  ;;  %v190_v26 = vpop.f32.mrb[5].mxu0  ;;  %v222_v27 = vpop.f32.mrb[5].mxu1 }
  0xff   :  { %241 = vst [vmem:[%s466_s2 + $0x20] sm:$0xff] %v190_v26  ;;  %249 = vst [vmem:[%s466_s2 + $0x60] sm:$0xff] %v222_v27  ;;  %v312_v28 = vpop.f32.mrb[6].mxu0  ;;  %v320_v29 = vpop.f32.mrb[6].mxu1 }
 0x100   :  { %244 = vst [vmem:[%s466_s2 + $0x38] sm:$0xff] %v312_v28  ;;  %252 = vst [vmem:[%s466_s2 + $0x78] sm:$0xff] %v320_v29  ;;  %v193_v30 = vpop.f32.mrb[7].mxu0  ;;  %v225_v31 = vpop.f32.mrb[7].mxu1 }
 0x101   :  { %242 = vst [vmem:[%s466_s2 + $0x28] sm:$0xff] %v193_v30  ;;  %250 = vst [vmem:[%s466_s2 + $0x68] sm:$0xff] %v225_v31 }

// kernel: gcn_classifier_forward.4
= control target key start
LH: loop header
LB: loop body
LE: loop exit
PB: predicated region body
PF: predicated region fallthrough
CT: control target
= control target key end

     0   :  { %v256_v24 = vlaneseq  ;;  %s902_s1 = inlined_call_operand.vmem [shape: bf16[128,128], index: 1, kind: input, shape index: {}]   ;;  %s903_s0 = inlined_call_operand.vmem [shape: bf16[128,128], index: 0, kind: input, shape index: {}]   ;;  %s904_s2 = inlined_call_operand.vmem [shape: bf16[128,128], index: 2, kind: input, shape index: {}]   ;;  %s905_s3 = inlined_call_operand.vmem [shape: bf16[128,128], index: 3, kind: output, shape index: {}]  }
   0x1   :  { %v727_v0 = vld [vmem:[%s902_s1] sm:$0xff]   ;;  %v728_v1 = vld [vmem:[%s902_s1 + $0x8] sm:$0xff]   ;;  %v729_v2 = vld [vmem:[%s902_s1 + $0x10] sm:$0xff]  }
   0x2   :  { %663 = vmatprep.subr.bf16.mxu0 %v727_v0  ;;  %v730_v3 = vld [vmem:[%s902_s1 + $0x18] sm:$0xff]   ;;  %v735_v4 = vld [vmem:[%s903_s0] sm:$0xff]   ;;  %v732_v6 = vld [vmem:[%s902_s1 + $0x28] sm:$0xff]   ;;  %v843_v25 = vand.u32 127, %v256_v24 }
   0x3   :  { %664 = vmatpush3.bf16.msra.mxu0 %v727_v0  ;;  %679 = vmatprep.mubr.bf16.mxu0 %v735_v4  ;;  %v731_v5 = vld [vmem:[%s902_s1 + $0x20] sm:$0xff]   ;;  %v744_v8 = vld [vmem:[%s904_s2 + $0x8] sm:$0xff]   ;;  %v733_v9 = vld [vmem:[%s902_s1 + $0x30] sm:$0xff]  }
   0x4   :  { %665 = vmatprep.subr.bf16.mxu0 %v728_v1  ;;  %v743_v7 = vld [vmem:[%s904_s2] sm:$0xff]   ;;  %v745_v10 = vld [vmem:[%s904_s2 + $0x10] sm:$0xff]   ;;  %v734_v11 = vld [vmem:[%s902_s1 + $0x38] sm:$0xff]   ;;  %vm258_vm0 = vcmp.eq.s32.totalorder %v843_v25, 64 }
   0x5   :  { %695 = vmatprep.subr.bf16.mxu1 %v743_v7  ;;  %v746_v12 = vld [vmem:[%s904_s2 + $0x18] sm:$0xff]   ;;  %v747_v13 = vld [vmem:[%s904_s2 + $0x20] sm:$0xff]   ;;  %v736_v14 = vld [vmem:[%s903_s0 + $0x8] sm:$0xff]  }
   0x6   :  { %696 = vmatpush3.bf16.msra.mxu1 %v743_v7  ;;  %v737_v15 = vld [vmem:[%s903_s0 + $0x10] sm:$0xff]   ;;  %v748_v16 = vld [vmem:[%s904_s2 + $0x28] sm:$0xff]   ;;  %v738_v17 = vld [vmem:[%s903_s0 + $0x18] sm:$0xff]  }
   0x7   :  { %666 = vmatpush3.bf16.msra.mxu0 %v728_v1  ;;  %697 = vmatprep.subr.bf16.mxu1 %v744_v8  ;;  %v739_v18 = vld [vmem:[%s903_s0 + $0x20] sm:$0xff]   ;;  %v740_v19 = vld [vmem:[%s903_s0 + $0x28] sm:$0xff]   ;;  %v741_v20 = vld [vmem:[%s903_s0 + $0x30] sm:$0xff]  }
   0x8   :  { %667 = vmatprep.subr.bf16.mxu0 %v729_v2  ;;  %v742_v21 = vld [vmem:[%s903_s0 + $0x38] sm:$0xff]   ;;  %v749_v22 = vld [vmem:[%s904_s2 + $0x30] sm:$0xff]  }
   0x9   :  { %v750_v23 = vld [vmem:[%s904_s2 + $0x38] sm:$0xff]  }
   0xa   :  { %698 = vmatpush3.bf16.msra.mxu1 %v744_v8 }
   0xb   :  { %668 = vmatpush3.bf16.msra.mxu0 %v729_v2  ;;  %699 = vmatprep.subr.bf16.mxu1 %v745_v10 }
   0xc   :  { %669 = vmatprep.subr.bf16.mxu0 %v730_v3 }
   0xe   :  { %700 = vmatpush3.bf16.msra.mxu1 %v745_v10 }
   0xf   :  { %670 = vmatpush3.bf16.msra.mxu0 %v730_v3  ;;  %701 = vmatprep.subr.bf16.mxu1 %v746_v12 }
  0x10   :  { %671 = vmatprep.subr.bf16.mxu0 %v731_v5 }
  0x12   :  { %702 = vmatpush3.bf16.msra.mxu1 %v746_v12 }
  0x13   :  { %672 = vmatpush3.bf16.msra.mxu0 %v731_v5  ;;  %703 = vmatprep.subr.bf16.mxu1 %v747_v13 }
  0x14   :  { %673 = vmatprep.subr.bf16.mxu0 %v732_v6 }
  0x16   :  { %704 = vmatpush3.bf16.msra.mxu1 %v747_v13 }
  0x17   :  { %674 = vmatpush3.bf16.msra.mxu0 %v732_v6  ;;  %705 = vmatprep.subr.bf16.mxu1 %v748_v16 }
  0x18   :  { %675 = vmatprep.subr.bf16.mxu0 %v733_v9 }
  0x1a   :  { %706 = vmatpush3.bf16.msra.mxu1 %v748_v16 }
  0x1b   :  { %676 = vmatpush3.bf16.msra.mxu0 %v733_v9  ;;  %707 = vmatprep.subr.bf16.mxu1 %v749_v22 }
  0x1c   :  { %677 = vmatprep.subr.bf16.mxu0 %v734_v11 }
  0x1e   :  { %708 = vmatpush3.bf16.msra.mxu1 %v749_v22 }
  0x1f   :  { %678 = vmatpush3.bf16.msra.mxu0 %v734_v11  ;;  %709 = vmatprep.subr.bf16.mxu1 %v750_v23 }
  0x22   :  { %680 = vmatmul.mubr.bf16.vlgmr.msra.gmra.mrb[0].mxu0 %v736_v14  ;;  %710 = vmatpush3.bf16.msra.mxu1 %v750_v23 }
  0x23   :  { %683 = vmatprep.mubr.bf16.mxu0 %v737_v15 }
  0x2a   :  { %684 = vmatmul.mubr.bf16.gmra.mrb[4].mxu0 %v738_v17 }
  0x2b   :  { %687 = vmatprep.mubr.bf16.mxu0 %v739_v18 }
  0x32   :  { %688 = vmatmul.mubr.bf16.gmra.mrb[8].mxu0 %v740_v19 }
  0x33   :  { %691 = vmatprep.mubr.bf16.mxu0 %v741_v20 }
  0x3a   :  { %692 = vmatmul.mubr.bf16.gmra.mrb[12].mxu0 %v742_v21 }
  0xf5   :  { %v681_v26 = vpop.f32.mrb[0].mxu0 }
  0xf6   :  { %v242_v27 = vmax.f32 %v681_v26, 0.0  ;;  %v177_v28 = vpop.f32.mrb[1].mxu0 }
  0xf7   :  { %v240_v29 = vmax.f32 %v177_v28, 0.0  ;;  %v682_v30 = vpop.f32.mrb[2].mxu0 }
  0xf8   :  { %v243_v31 = vmax.f32 %v682_v30, 0.0  ;;  %v180_v32 = vpop.f32.mrb[3].mxu0  ;;  %v261_v34 = vsel %vm258_vm0, 1.0, %v242_v27 }
  0xf9   :  { %v241_v33 = vmax.f32 %v180_v32, 0.0  ;;  %v259_v37 = vsel %vm258_vm0, 1.0, %v240_v29 }
  0xfa   :  { %v262_v35 = vsel %vm258_vm0, 1.0, %v243_v31 }
  0xfb   :  { %v276_v36 = vpack.c.bf16 %v262_v35, %v261_v34  ;;  %v260_v38 = vsel %vm258_vm0, 1.0, %v241_v33 }
  0xfc   :  { %v275_v39 = vpack.c.bf16 %v260_v38, %v259_v37 }
  0xfd   :  { %v685_v40 = vpop.f32.mrb[4].mxu0 }
  0xfe   :  { %v246_v41 = vmax.f32 %v685_v40, 0.0  ;;  %v193_v42 = vpop.f32.mrb[5].mxu0  ;;  %711 = vmatprep.mubr.bf16.mxu1 %v275_v39 }
  0xff   :  { %v244_v43 = vmax.f32 %v193_v42, 0.0  ;;  %v686_v44 = vpop.f32.mrb[6].mxu0  ;;  %712 = vmatmul.mubr.bf16.vlgmr.msra.gmra.mrb[0].mxu1 %v276_v36 }
 0x100   :  { %v247_v45 = vmax.f32 %v686_v44, 0.0  ;;  %v196_v46 = vpop.f32.mrb[7].mxu0  ;;  %v265_v48 = vsel %vm258_vm0, 1.0, %v246_v41 }
 0x101   :  { %v245_v47 = vmax.f32 %v196_v46, 0.0  ;;  %v263_v50 = vsel %vm258_vm0, 1.0, %v244_v43 }
 0x102   :  { %v266_v49 = vsel %vm258_vm0, 1.0, %v247_v45 }
 0x103   :  { %v278_v51 = vpack.c.bf16 %v266_v49, %v265_v48  ;;  %v264_v52 = vsel %vm258_vm0, 1.0, %v245_v47 }
 0x104   :  { %v277_v53 = vpack.c.bf16 %v264_v52, %v263_v50 }
 0x105   :  { %v689_v54 = vpop.f32.mrb[8].mxu0 }
 0x106   :  { %v250_v55 = vmax.f32 %v689_v54, 0.0  ;;  %v209_v56 = vpop.f32.mrb[9].mxu0  ;;  %715 = vmatprep.mubr.bf16.mxu1 %v277_v53 }
 0x107   :  { %v248_v57 = vmax.f32 %v209_v56, 0.0  ;;  %v690_v58 = vpop.f32.mrb[10].mxu0  ;;  %716 = vmatmul.mubr.bf16.gmra.mrb[4].mxu1 %v278_v51 }
 0x108   :  { %v251_v59 = vmax.f32 %v690_v58, 0.0  ;;  %v212_v60 = vpop.f32.mrb[11].mxu0  ;;  %v269_v62 = vsel %vm258_vm0, 1.0, %v250_v55 }
 0x109   :  { %v249_v61 = vmax.f32 %v212_v60, 0.0  ;;  %v267_v0 = vsel %vm258_vm0, 1.0, %v248_v57 }
 0x10a   :  { %v270_v63 = vsel %vm258_vm0, 1.0, %v251_v59 }
 0x10b   :  { %v280_v1 = vpack.c.bf16 %v270_v63, %v269_v62  ;;  %v268_v2 = vsel %vm258_vm0, 1.0, %v249_v61 }
 0x10c   :  { %v279_v3 = vpack.c.bf16 %v268_v2, %v267_v0 }
 0x10d   :  { %v693_v4 = vpop.f32.mrb[12].mxu0 }
 0x10e   :  { %v254_v5 = vmax.f32 %v693_v4, 0.0  ;;  %v225_v6 = vpop.f32.mrb[13].mxu0  ;;  %719 = vmatprep.mubr.bf16.mxu1 %v279_v3 }
 0x10f   :  { %v252_v7 = vmax.f32 %v225_v6, 0.0  ;;  %v694_v8 = vpop.f32.mrb[14].mxu0  ;;  %720 = vmatmul.mubr.bf16.gmra.mrb[8].mxu1 %v280_v1 }
 0x110   :  { %v255_v9 = vmax.f32 %v694_v8, 0.0  ;;  %v228_v10 = vpop.f32.mrb[15].mxu0  ;;  %v273_v12 = vsel %vm258_vm0, 1.0, %v254_v5 }
 0x111   :  { %v253_v11 = vmax.f32 %v228_v10, 0.0  ;;  %v271_v14 = vsel %vm258_vm0, 1.0, %v252_v7 }
 0x112   :  { %v274_v13 = vsel %vm258_vm0, 1.0, %v255_v9 }
 0x113   :  { %v282_v15 = vpack.c.bf16 %v274_v13, %v273_v12  ;;  %v272_v16 = vsel %vm258_vm0, 1.0, %v253_v11 }
 0x114   :  { %v281_v17 = vpack.c.bf16 %v272_v16, %v271_v14 }
 0x116   :  { %723 = vmatprep.mubr.bf16.mxu1 %v281_v17 }
 0x117   :  { %724 = vmatmul.mubr.bf16.gmra.mrb[12].mxu1 %v282_v15 }
 0x1d2   :  { %v713_v18 = vpop.f32.mrb[0].mxu1 }
 0x1d3   :  { %v381_v19 = vpop.f32.mrb[1].mxu1 }
 0x1d4   :  { %v714_v20 = vpop.f32.mrb[2].mxu1 }
 0x1d5   :  { %v592_v21 = vpack.c.bf16 %v714_v20, %v713_v18  ;;  %v384_v22 = vpop.f32.mrb[3].mxu1 }
 0x1d6   :  { %v587_v23 = vpack.c.bf16 %v384_v22, %v381_v19 }
 0x1d7   :  { %624 = vst [vmem:[%s905_s3 + $0x8] sm:$0xff] %v592_v21  }
 0x1d8   :  { %588 = vst [vmem:[%s905_s3] sm:$0xff] %v587_v23  }
 0x1da   :  { %v717_v24 = vpop.f32.mrb[4].mxu1 }
 0x1db   :  { %v397_v25 = vpop.f32.mrb[5].mxu1 }
 0x1dc   :  { %v718_v26 = vpop.f32.mrb[6].mxu1 }
 0x1dd   :  { %v602_v27 = vpack.c.bf16 %v718_v26, %v717_v24  ;;  %v400_v28 = vpop.f32.mrb[7].mxu1 }
 0x1de   :  { %v597_v29 = vpack.c.bf16 %v400_v28, %v397_v25 }
 0x1df   :  { %626 = vst [vmem:[%s905_s3 + $0x18] sm:$0xff] %v602_v27  }
 0x1e0   :  { %625 = vst [vmem:[%s905_s3 + $0x10] sm:$0xff] %v597_v29  }
 0x1e2   :  { %v721_v30 = vpop.f32.mrb[8].mxu1 }
 0x1e3   :  { %v413_v31 = vpop.f32.mrb[9].mxu1 }
 0x1e4   :  { %v722_v32 = vpop.f32.mrb[10].mxu1 }
 0x1e5   :  { %v612_v33 = vpack.c.bf16 %v722_v32, %v721_v30  ;;  %v416_v34 = vpop.f32.mrb[11].mxu1 }
 0x1e6   :  { %v607_v35 = vpack.c.bf16 %v416_v34, %v413_v31 }
 0x1e7   :  { %628 = vst [vmem:[%s905_s3 + $0x28] sm:$0xff] %v612_v33  }
 0x1e8   :  { %627 = vst [vmem:[%s905_s3 + $0x20] sm:$0xff] %v607_v35  }
 0x1ea   :  { %v725_v36 = vpop.f32.mrb[12].mxu1 }
 0x1eb   :  { %v429_v37 = vpop.f32.mrb[13].mxu1 }
 0x1ec   :  { %v726_v38 = vpop.f32.mrb[14].mxu1 }
 0x1ed   :  { %v622_v39 = vpack.c.bf16 %v726_v38, %v725_v36  ;;  %v432_v40 = vpop.f32.mrb[15].mxu1 }
 0x1ee   :  { %v617_v41 = vpack.c.bf16 %v432_v40, %v429_v37 }
 0x1ef   :  { %630 = vst [vmem:[%s905_s3 + $0x38] sm:$0xff] %v622_v39  }
 0x1f0   :  { %629 = vst [vmem:[%s905_s3 + $0x30] sm:$0xff] %v617_v41  }

</bundles_post_ra>
